<compile_context>
chip_gen: v5e
topology: v5e:2x2
jax: 0.10.0
libtpu: 0.0.40
codegen_flags: <defaults>
</compile_context>

<pallas_src>
import jax
import jax.numpy as jnp
from jax import lax
from jax.experimental import pallas as pl
from jax.experimental.pallas import tpu as pltpu

LANE = 128
SUBLANE = 8
CHUNK_ROWS = 128                       # rows folded per inner-loop step (bounds live vregs)
TARGET_BLOCK_BYTES = 8 * 1024 * 1024   # combined (x + y) HBM bytes per grid step
VMEM_LIMIT_BYTES = 40 * 1024 * 1024    # > 2 inputs * 2 bufs * 4 MiB, < v7x 64 MiB physical


def _auto_row_tile(rows: int, bytes_per_row: int) -> int:
    t = TARGET_BLOCK_BYTES // bytes_per_row
    t = max(CHUNK_ROWS, (t // CHUNK_ROWS) * CHUNK_ROWS)
    return min(rows, t)


def _make_l1_partial_kernel(row_tile: int, last_rows: int):
    """Per-block kernel: o_ref[(8,128)] = sum of |x - y| over the block's valid rows."""

    def folded_abs_diff_sum(x_ref, y_ref, nrows: int):
        # Sum |x - y| over the first `nrows` (static) rows of the block, folded
        # into an (8, 128) vreg-shaped partial (pure VALU adds, no cross-lane work).
        n_chunks, rem = divmod(nrows, CHUNK_ROWS)

        def chunk_sum(row0, crows: int):
            xs = x_ref[pl.ds(row0, crows), :].astype(jnp.float32)
            ys = y_ref[pl.ds(row0, crows), :].astype(jnp.float32)
            ad = jnp.abs(xs - ys)
            # (crows, 128) -> (8, 128): never crosses an (8, 128) tile boundary.
            return ad.reshape(crows // SUBLANE, SUBLANE, LANE).sum(axis=0)

        acc = jnp.zeros((SUBLANE, LANE), jnp.float32)
        if n_chunks > 0:
            def body(c, a):
                row0 = pl.multiple_of(c * CHUNK_ROWS, CHUNK_ROWS)
                return a + chunk_sum(row0, CHUNK_ROWS)

            acc = lax.fori_loop(0, n_chunks, body, acc)
        if rem:
            acc = acc + chunk_sum(n_chunks * CHUNK_ROWS, rem)
        return acc

    if last_rows == row_tile:
        # Every grid block is full: single unconditional path, no masking at all.
        def kernel(x_ref, y_ref, o_ref):
            o_ref[...] = folded_abs_diff_sum(x_ref, y_ref, row_tile)
    else:
        # Only the last block is partial; it runs a statically shorter
        # accumulation — non-last blocks pay nothing extra.
        def kernel(x_ref, y_ref, o_ref):
            is_last = pl.program_id(0) == pl.num_programs(0) - 1

            @pl.when(jnp.logical_not(is_last))
            def _():
                o_ref[...] = folded_abs_diff_sum(x_ref, y_ref, row_tile)

            @pl.when(is_last)
            def _():
                o_ref[...] = folded_abs_diff_sum(x_ref, y_ref, last_rows)

    return kernel


def l1_loss(input: jax.Array, target: jax.Array, *, block_rows: int | None = None) -> jax.Array:
    """Pallas equivalent of F.l1_loss(input, target) with reduction='mean'."""
    assert input.shape == target.shape, "l1_loss requires matching shapes"
    n_true = int(input.size)
    assert n_true > 0
    out_dtype = jnp.result_type(input.dtype, target.dtype)

    x = input.reshape(-1)   # bitcast, free
    y = target.reshape(-1)

    chunk = SUBLANE * LANE  # 1024
    n_aligned = (n_true // chunk) * chunk
    n_tail = n_true - n_aligned

    total = jnp.zeros((), jnp.float32)

    if n_aligned:
        # Aligned case (common for image tensors): pure bitcast reshape, no copy.
        # Unaligned case: prefix slice only (no full-array pad); the tail is
        # handled below with a tiny jnp sum.
        xm = x if n_tail == 0 else lax.slice(x, (0,), (n_aligned,))
        ym = y if n_tail == 0 else lax.slice(y, (0,), (n_aligned,))
        rows = n_aligned // LANE                     # multiple of 8
        x2 = xm.reshape(rows, LANE)
        y2 = ym.reshape(rows, LANE)

        bytes_per_row = LANE * (x2.dtype.itemsize + y2.dtype.itemsize)
        row_tile = block_rows if block_rows is not None else _auto_row_tile(rows, bytes_per_row)
        row_tile = min(row_tile, rows)
        assert row_tile % SUBLANE == 0

        num_blocks = pl.cdiv(rows, row_tile)
        last_rows = rows - (num_blocks - 1) * row_tile   # static, in (0, row_tile]

        kernel = _make_l1_partial_kernel(row_tile, last_rows)

        partials = pl.pallas_call(
            kernel,
            out_shape=jax.ShapeDtypeStruct((num_blocks * SUBLANE, LANE), jnp.float32),
            grid=(num_blocks,),
            in_specs=[
                pl.BlockSpec((row_tile, LANE), lambda i: (i, 0)),
                pl.BlockSpec((row_tile, LANE), lambda i: (i, 0)),
            ],
            out_specs=pl.BlockSpec((SUBLANE, LANE), lambda i: (i, 0)),
            compiler_params=pltpu.CompilerParams(
                dimension_semantics=("parallel",),
                vmem_limit_bytes=VMEM_LIMIT_BYTES,
            ),
        )(x2, y2)
        total = total + jnp.sum(partials, dtype=jnp.float32)

    if n_tail:
        # < 1024 leftover elements: negligible HBM traffic, plain jnp.
        xt = lax.slice(x, (n_aligned,), (n_true,)).astype(jnp.float32)
        yt = lax.slice(y, (n_aligned,), (n_true,)).astype(jnp.float32)
        total = total + jnp.sum(jnp.abs(xt - yt), dtype=jnp.float32)

    return (total * jnp.float32(1.0 / n_true)).astype(out_dtype)


def image_restoration_loss(input: jax.Array, target: jax.Array) -> jax.Array:
    """Forward pass of the PyTorch ImageRestorationLoss module."""
    return l1_loss(input, target)


if __name__ == "__main__":
    key = jax.random.PRNGKey(0)

    def ref_l1(a, b):
        return jnp.mean(jnp.abs(a.astype(jnp.float32) - b.astype(jnp.float32)))

    # 1) Canonical small NCHW image-restoration shape (1024-aligned, single block).
    k1, k2, key = jax.random.split(key, 3)
    shape = (2, 4, 16, 16)
    inp = jax.random.normal(k1, shape, dtype=jnp.float32)
    tgt = jax.random.normal(k2, shape, dtype=jnp.float32)
    loss = image_restoration_loss(inp, tgt)
    jax.block_until_ready(loss)
    assert jnp.allclose(loss, ref_l1(inp, tgt), rtol=1e-5, atol=1e-6), "case1"

    # 2) Unaligned numel: exercises the aligned-prefix kernel + jnp tail path.
    k1, k2, key = jax.random.split(key, 3)
    inp2 = jax.random.normal(k1, (2, 3, 17, 17), dtype=jnp.float32)
    tgt2 = jax.random.normal(k2, (2, 3, 17, 17), dtype=jnp.float32)
    loss2 = l1_loss(inp2, tgt2)
    jax.block_until_ready(loss2)
    assert jnp.allclose(loss2, ref_l1(inp2, tgt2), rtol=1e-5, atol=1e-6), "case2"

    # 3) Multi-block grid with a partial last block + in-kernel fori_loop
    #    (forced small block size so the full-size code paths are exercised).
    k1, k2, key = jax.random.split(key, 3)
    inp3 = jax.random.normal(k1, (3, 4, 64, 64), dtype=jnp.float32)
    tgt3 = jax.random.normal(k2, (3, 4, 64, 64), dtype=jnp.float32)
    loss3 = l1_loss(inp3, tgt3, block_rows=256)
    jax.block_until_ready(loss3)
    assert jnp.allclose(loss3, ref_l1(inp3, tgt3), rtol=1e-5, atol=1e-6), "case3"

    # 4) bf16 inputs: in-kernel upcast, dtype-aware tiling, bf16 output dtype.
    k1, k2, key = jax.random.split(key, 3)
    inp4 = jax.random.normal(k1, (2, 4, 16, 16), dtype=jnp.bfloat16)
    tgt4 = jax.random.normal(k2, (2, 4, 16, 16), dtype=jnp.bfloat16)
    loss4 = l1_loss(inp4, tgt4)
    jax.block_until_ready(loss4)
    assert loss4.dtype == jnp.bfloat16
    assert jnp.allclose(loss4.astype(jnp.float32), ref_l1(inp4, tgt4), rtol=2e-2), "case4"

    print("KERNEL_OK")
</pallas_src>

<mosaic_0001>
module attributes {stable_mosaic.version = 11 : i64} {
  func.func @kernel(%arg0: i32, %arg1: memref<16x128xf32, #tpu.memory_space<vmem>>, %arg2: memref<16x128xf32, #tpu.memory_space<vmem>>, %arg3: memref<8x128xf32, #tpu.memory_space<vmem>>) attributes {dimension_semantics = [#tpu.dimension_semantics<parallel>], iteration_bounds = array<i64: 1>, scalar_prefetch = 0 : i64, scratch_operands = 0 : i64, tpu.core_type = #tpu.core_type<tc>, window_params = [{transform_indices = @transform_0, window_bounds = array<i64: 16, 128>}, {transform_indices = @transform_1, window_bounds = array<i64: 16, 128>}, {transform_indices = @transform_2, window_bounds = array<i64: 8, 128>}]} {
    %cst = arith.constant 0.000000e+00 : f32
    %0 = vector.broadcast %cst : f32 to vector<8x128xf32>
    %c0 = arith.constant 0 : index
    %c0_0 = arith.constant 0 : index
    %1 = vector.load %arg1[%c0, %c0_0] : memref<16x128xf32, #tpu.memory_space<vmem>>, vector<16x128xf32>
    %c0_1 = arith.constant 0 : index
    %c0_2 = arith.constant 0 : index
    %2 = vector.load %arg2[%c0_1, %c0_2] : memref<16x128xf32, #tpu.memory_space<vmem>>, vector<16x128xf32>
    %3 = arith.subf %1, %2 : vector<16x128xf32>
    %4 = math.absf %3 : vector<16x128xf32>
    %5 = vector.shape_cast %4 : vector<16x128xf32> to vector<2x8x128xf32>
    %cst_3 = arith.constant dense<0.000000e+00> : vector<8x128xf32>
    %6 = vector.multi_reduction <add>, %5, %cst_3 [0] : vector<2x8x128xf32> to vector<8x128xf32>
    %7 = arith.addf %0, %6 : vector<8x128xf32>
    %c0_4 = arith.constant 0 : index
    %c0_5 = arith.constant 0 : index
    %8 = vector.load %arg3[%c0_4, %c0_5] : memref<8x128xf32, #tpu.memory_space<vmem>>, vector<8x128xf32>
    tpu.vector_store %arg3[%c0_4, %c0_5], %7 {strides = array<i32>} : memref<8x128xf32, #tpu.memory_space<vmem>>, vector<8x128xf32>,
    return
  }
  func.func @transform_0(%arg0: i32) -> (i32, i32) {
    %c0_i32 = arith.constant 0 : i32
    %c0_i32_0 = arith.constant 0 : i32
    return %arg0, %c0_i32 : i32, i32
  }
  func.func @transform_1(%arg0: i32) -> (i32, i32) {
    %c0_i32 = arith.constant 0 : i32
    %c0_i32_0 = arith.constant 0 : i32
    return %arg0, %c0_i32 : i32, i32
  }
  func.func @transform_2(%arg0: i32) -> (i32, i32) {
    %c0_i32 = arith.constant 0 : i32
    %c0_i32_0 = arith.constant 0 : i32
    return %arg0, %c0_i32 : i32, i32
  }
}

</mosaic_0001>

<bundles_post_ra>
// kernel: tpu_custom_call.1
= control target key start
LH: loop header
LB: loop body
LE: loop exit
PB: predicated region body
PF: predicated region fallthrough
CT: control target
= control target key end

     0   :  { %7 = vsyncpa [#allocation3], 0  ;;  %s185_s0 = inlined_call_operand.hbm [shape: f32[16,128], index: 0, kind: input, shape index: {}]   ;;  %s186_s1 = inlined_call_operand.hbm [shape: f32[16,128], index: 1, kind: input, shape index: {}]   ;;  %s187_s2 = inlined_call_operand.hbm [shape: f32[8,128], index: 2, kind: output, shape index: {}]  }
   0x1   :  { %8 = vsyncpa [#allocation6], 0 }
   0x2   :  { %9 = vsyncpa [#allocation4], 0  ;;  %s14_s11 = sshll.u32 %s185_s0, 4  ;;  %s156_s12 = smov [#allocation2]   ;;  %s15_s11 = int_to_ptr.hbm [resolvable:$true] %s14_s11 }
   0x3   :  { %s16_s13 = sshll.u32 %s156_s12, 4  ;;  %s27_s16 = sshll.u32 %s186_s1, 4  ;;  %s17_s13 = int_to_ptr.vmem [resolvable:$true] %s16_s13  ;;  %s28_s16 = int_to_ptr.hbm [resolvable:$true] %s27_s16 }
   0x4   :  { %s157_s17 = smov 128   ;;  %s158_s18 = smov 8  }
   0x5   :  { %22 = dma.hbm_to_vmem [thread:$0]  %s15_s11, 256, %s17_s13, [#allocation3], %s157_s17, %s157_s17, %s158_s18  }
   0x6   :  { %s159_s19 = smov [#allocation5]  }
   0x7   :  { %s29_s20 = sshll.u32 %s159_s19, 4  ;;  %s30_s20 = int_to_ptr.vmem [resolvable:$true] %s29_s20 }
   0x8   :  { %35 = dma.hbm_to_vmem [thread:$0]  %s28_s16, 256, %s30_s20, [#allocation6], %s157_s17, %s157_s17, %s158_s18  }
   0x9   :  { %150 = dma.done.wait [#allocation3], 256  }
   0xa   :  { %151 = vsyncadd [#allocation3], 4294967040 }
   0xb   :  { %152 = dma.done.wait [#allocation6], 256  }
   0xc   :  { %153 = vsyncadd [#allocation6], 4294967040  ;;  %v44_v0 = vld [vmem:[#allocation2] sm:$0xff]  ;;  %v45_v1 = vld [vmem:[#allocation2 + $0x8] sm:$0xff]  ;;  %s160_s0 = smov [#allocation7]   ;;  %s62_s23 = sshll.u32 %s187_s2, 4  ;;  %s63_s23 = int_to_ptr.hbm [resolvable:$true] %s62_s23 }
   0xd   :  { %v46_v2 = vld [vmem:[#allocation5] sm:$0xff]  ;;  %v47_v3 = vld [vmem:[#allocation5 + $0x8] sm:$0xff]  ;;  %s60_s1 = sshll.u32 %s160_s0, 4  ;;  %s61_s1 = int_to_ptr.vmem [resolvable:$true] %s60_s1 }
   0xe   :  { %v48_v4 = vsub.f32 %v44_v0, %v46_v2  ;;  %v49_v5 = vsub.f32 %v45_v1, %v47_v3 }
  0x10   :  { %v50_v6 = vand.u32 2147483647, %v48_v4  ;;  %v51_v7 = vand.u32 2147483647, %v49_v5 }
  0x12   :  { %v52_v8 = vadd.f32 %v51_v7, %v50_v6 }
  0x14   :  { %54 = vst [vmem:[#allocation7] sm:$0xff] %v52_v8 }
  0x15   :  { %65 = dma.vmem_to_hbm [thread:$0]  %s61_s1, 128, %s63_s23, [#allocation4]  }
  0x16   :  { %154 = dma.done.wait [#allocation4], 128  }
  0x17   :  { %155 = vsyncadd [#allocation4], 4294967168 }
  0x18   :  { %70 = vsyncpa [#allocation3], 1 }
  0x19   :  { %71 = vsyncpa [#allocation6], 1 }
  0x1a   :  { %72 = vsyncpa [#allocation4], 1 }

</bundles_post_ra>
